<compile_context>
chip_gen: v6e
topology: v6e:2x2x1
jax: 0.10.0
libtpu: 0.0.40
codegen_flags: <defaults>
</compile_context>

<pallas_src>
import functools

import jax
import jax.numpy as jnp
from jax.experimental import pallas as pl
from jax.experimental.pallas import tpu as pltpu


def _round_up(x: int, m: int) -> int:
    return ((x + m - 1) // m) * m


def _triangle_kernel(x_ref, o_ref, *, power: float, inv_c: float,
                     narrow_compute: bool):
    # x_ref / o_ref: (Bt, C, HW_T) VMEM tiles.
    x = x_ref[...]

    # Per-pixel channel mean: one sublane-axis reduction (f32 accumulation) and
    # one VPU multiply by the compile-time constant 1/C (no divide, no EUP).
    mean = jnp.sum(x.astype(jnp.float32), axis=1, keepdims=True) * inv_c

    if narrow_compute:
        # bf16 elementwise chain (v6e/v7x VALU) — halves vreg pressure.
        y = jnp.maximum(x - mean.astype(x.dtype), 0)
    else:
        y = jnp.maximum(x.astype(jnp.float32) - mean, 0.0)

    p = float(power)
    if p == 1.0:
        pass
    elif p.is_integer() and abs(p) <= 16.0:
        # lax.integer_pow -> repeated VPU multiplies (p==0 -> ones, like torch).
        y = y ** int(p)
    else:
        # General float power lowers to exp(p*log(y)) on the EUP.
        y = y.astype(jnp.float32) ** p

    o_ref[...] = y.astype(o_ref.dtype)


def _choose_tiling(B: int, C: int, HW: int, itemsize: int):
    """Pick (Bt, HW_T): batch-rows-per-block and spatial lane tile."""
    sublane = {4: 8, 2: 16, 1: 32}.get(itemsize, 8)
    padded_c = _round_up(C, sublane)

    # 2 arrays (in+out) x 2 pipeline buffers => 4x block bytes must fit here.
    TOTAL_IO_BUDGET = 32 * 1024 * 1024
    # Per-block target (~1-4 MiB amortizes ~0.35us/step + DMA row granularity).
    TARGET_BLOCK = 4 * 1024 * 1024

    bytes_per_lane = padded_c * itemsize      # one lane column of one batch row
    bytes_full_hw = bytes_per_lane * HW

    # Spatial tile: full extent if it fits the pipelined budget, otherwise the
    # largest 128-multiple under the per-block target.
    if bytes_full_hw * 4 <= TOTAL_IO_BUDGET:
        hw_t = HW
    else:
        max_lanes = min(TARGET_BLOCK, TOTAL_IO_BUDGET // 4) // max(bytes_per_lane, 1)
        hw_t = max(128, (max_lanes // 128) * 128)
        hw_t = min(hw_t, _round_up(HW, 128))
        if hw_t >= HW:
            hw_t = HW
    n_spatial = -(-HW // hw_t)

    # Batch fold: largest divisor of B whose block still fits the budget while
    # keeping a total grid of >= 2 steps (so both v7x TensorCores get work).
    per_batch_block = bytes_per_lane * hw_t
    divisors = [d for d in range(1, B + 1) if B % d == 0]
    fitting = [d for d in divisors if d * per_batch_block * 4 <= TOTAL_IO_BUDGET]
    if not fitting:
        fitting = [1]

    bt = 1
    for d in sorted(fitting, reverse=True):
        if (B // d) * n_spatial >= 2:
            bt = d
            break

    # If the chosen fold leaves a tiny odd grid, relax one notch to get an
    # even step count for the 2-TC split.
    steps = (B // bt) * n_spatial
    if steps < 8 and steps % 2 == 1:
        for d in sorted(fitting, reverse=True):
            if d < bt and ((B // d) * n_spatial) % 2 == 0:
                bt = d
                break
    return bt, hw_t


def triangle(x: jax.Array, power: float = 1.0, *,
             block_b: int | None = None, block_hw: int | None = None) -> jax.Array:
    """Pallas implementation of Triangle.forward for NCHW input."""
    B, C, H, W = x.shape
    HW = H * W
    itemsize = jnp.dtype(x.dtype).itemsize

    bt, hw_t = _choose_tiling(B, C, HW, itemsize)
    if block_b is not None:
        bt = block_b
    if block_hw is not None:
        hw_t = block_hw
    assert B % bt == 0
    assert hw_t == HW or hw_t % 128 == 0

    x_flat = x.reshape(B, C, HW)
    grid = (B // bt, -(-HW // hw_t))

    kernel = functools.partial(
        _triangle_kernel,
        power=float(power),
        inv_c=1.0 / float(C),
        narrow_compute=(x.dtype == jnp.bfloat16),
    )

    out_flat = pl.pallas_call(
        kernel,
        out_shape=jax.ShapeDtypeStruct((B, C, HW), x.dtype),
        grid_spec=pltpu.PrefetchScalarGridSpec(
            num_scalar_prefetch=0,
            grid=grid,
            in_specs=[pl.BlockSpec((bt, C, hw_t), lambda b, s: (b, 0, s))],
            out_specs=pl.BlockSpec((bt, C, hw_t), lambda b, s: (b, 0, s)),
        ),
        compiler_params=pltpu.CompilerParams(
            dimension_semantics=("parallel", "parallel"),
            vmem_limit_bytes=48 * 1024 * 1024,
        ),
    )(x_flat)

    return out_flat.reshape(B, C, H, W)


def _triangle_ref(x: jax.Array, power: float = 1.0) -> jax.Array:
    # Pure-JAX reference (mirrors the PyTorch forward), computed in f32.
    xf = x.astype(jnp.float32)
    mean = jnp.mean(xf, axis=1, keepdims=True)
    return jnp.maximum(xf - mean, 0.0) ** power


if __name__ == "__main__":
    key = jax.random.PRNGKey(0)
    ok = True

    # Case 1: default power, 128-aligned spatial extent.
    B, C, H, W = 2, 4, 16, 16
    x = jax.random.normal(key, (B, C, H, W), dtype=jnp.float32)
    out = jax.block_until_ready(triangle(x, power=1.0))
    ok &= out.shape == (B, C, H, W)
    ok &= bool(jnp.allclose(out, _triangle_ref(x, 1.0), atol=1e-5, rtol=1e-5))

    # Case 2: integer power > 1 (VPU integer-pow path).
    out2 = jax.block_until_ready(triangle(x, power=2.0))
    ok &= bool(jnp.allclose(out2, _triangle_ref(x, 2.0), atol=1e-5, rtol=1e-5))

    # Case 3: spatial extent not a multiple of 128 (lane-masked store, no pad).
    x3 = jax.random.normal(jax.random.PRNGKey(1), (2, 4, 10, 10), dtype=jnp.float32)
    out3 = jax.block_until_ready(triangle(x3, power=1.0))
    ok &= out3.shape == (2, 4, 10, 10)
    ok &= bool(jnp.allclose(out3, _triangle_ref(x3, 1.0), atol=1e-5, rtol=1e-5))

    # Case 4: forced spatial tiling with a partial boundary block (HW=400, tile=128).
    x4 = jax.random.normal(jax.random.PRNGKey(3), (2, 4, 20, 20), dtype=jnp.float32)
    out4 = jax.block_until_ready(triangle(x4, power=1.0, block_hw=128))
    ok &= bool(jnp.allclose(out4, _triangle_ref(x4, 1.0), atol=1e-5, rtol=1e-5))

    # Case 5: bf16 I/O (narrow VALU compute path on v6e/v7x).
    xb = jax.random.normal(jax.random.PRNGKey(2), (2, 4, 16, 16),
                           dtype=jnp.float32).astype(jnp.bfloat16)
    outb = jax.block_until_ready(triangle(xb, power=1.0))
    meanb = jnp.mean(xb.astype(jnp.float32), axis=1, keepdims=True).astype(jnp.bfloat16)
    refb = jnp.maximum(xb - meanb, 0)
    ok &= bool(jnp.allclose(outb.astype(jnp.float32), refb.astype(jnp.float32),
                            atol=2e-2, rtol=2e-2))

    assert ok, "mismatch vs reference"
    print("KERNEL_OK")
</pallas_src>

<mosaic_0001>
module attributes {stable_mosaic.version = 11 : i64} {
  func.func @_triangle_kernel(%arg0: i32, %arg1: i32, %arg2: memref<1x4x256xf32, #tpu.memory_space<vmem>>, %arg3: memref<1x4x256xf32, #tpu.memory_space<vmem>>) attributes {dimension_semantics = [#tpu.dimension_semantics<parallel>, #tpu.dimension_semantics<parallel>], iteration_bounds = array<i64: 2, 1>, scalar_prefetch = 0 : i64, scratch_operands = 0 : i64, tpu.core_type = #tpu.core_type<tc>, window_params = [{transform_indices = @transform_0, window_bounds = array<i64: 1, 4, 256>}, {transform_indices = @transform_1, window_bounds = array<i64: 1, 4, 256>}]} {
    %c0 = arith.constant 0 : index
    %c0_0 = arith.constant 0 : index
    %c0_1 = arith.constant 0 : index
    %0 = vector.load %arg2[%c0, %c0_0, %c0_1] : memref<1x4x256xf32, #tpu.memory_space<vmem>>, vector<1x4x256xf32>
    %cst = arith.constant dense<0.000000e+00> : vector<1x256xf32>
    %1 = vector.multi_reduction <add>, %0, %cst [1] : vector<1x4x256xf32> to vector<1x256xf32>
    %2 = vector.shape_cast %1 : vector<1x256xf32> to vector<1x1x256xf32>
    %cst_2 = arith.constant 2.500000e-01 : f32
    %3 = vector.broadcast %cst_2 : f32 to vector<1x1x256xf32>
    %4 = arith.mulf %2, %3 : vector<1x1x256xf32>
    %5 = vector.broadcast %4 : vector<1x1x256xf32> to vector<1x4x256xf32>
    %6 = arith.subf %0, %5 : vector<1x4x256xf32>
    %cst_3 = arith.constant 0.000000e+00 : f32
    %7 = vector.broadcast %cst_3 : f32 to vector<1x4x256xf32>
    %8 = arith.maximumf %6, %7 : vector<1x4x256xf32>
    %c0_4 = arith.constant 0 : index
    %c0_5 = arith.constant 0 : index
    %c0_6 = arith.constant 0 : index
    %9 = vector.load %arg3[%c0_4, %c0_5, %c0_6] : memref<1x4x256xf32, #tpu.memory_space<vmem>>, vector<1x4x256xf32>
    tpu.vector_store %arg3[%c0_4, %c0_5, %c0_6], %8 {strides = array<i32>} : memref<1x4x256xf32, #tpu.memory_space<vmem>>, vector<1x4x256xf32>,
    return
  }
  func.func @transform_0(%arg0: i32, %arg1: i32) -> (i32, i32, i32) {
    %c0_i32 = arith.constant 0 : i32
    %c0_i32_0 = arith.constant 0 : i32
    return %arg0, %c0_i32, %arg1 : i32, i32, i32
  }
  func.func @transform_1(%arg0: i32, %arg1: i32) -> (i32, i32, i32) {
    %c0_i32 = arith.constant 0 : i32
    %c0_i32_0 = arith.constant 0 : i32
    return %arg0, %c0_i32, %arg1 : i32, i32, i32
  }
}

</mosaic_0001>

<bundles_post_ra>
// kernel: tpu_custom_call.1
= control target key start
LH: loop header
LB: loop body
LE: loop exit
PB: predicated region body
PF: predicated region fallthrough
CT: control target
= control target key end

     0   :  { %6 = vsyncpa [#allocation3], 0  ;;  %s618_s0 = inlined_call_operand.hbm [shape: f32[2,4,256], index: 0, kind: input, shape index: {}]   ;;  %s619_s1 = inlined_call_operand.hbm [shape: f32[2,4,256], index: 1, kind: output, shape index: {}]  }
   0x1   :  { %8 = vsyncpa [#allocation3 + $0x1], 0 }
   0x2   :  { %9 = vsyncpa [#allocation4], 0 }
   0x3   :  { %11 = vsyncpa [#allocation4 + $0x1], 0  ;;  %s484_s6 = smov 0   ;;  %s486_s7 = smov 0  }
   0x4   :  { %s488_s8 = smov 0   ;;  %s490_s9 = smov 0  }
   0x5   :  { %s492_s10 = smov 0   ;;  %s494_s11 = smov 0  }
   0x6 LB: > { %s282_s12 = sadd.s32 4294967295, %s470_s11   ;;  %s283_s13 = sadd.s32 4294967294, %s470_s11   ;;  %s470_s11 = sphi %s494_s11, %s17_s11   ;;  %s466_s10 = sphi %s492_s10, %s631_s10   ;;  %s462_s9 = sphi %s490_s9, %s630_s9   ;;  %s458_s8 = sphi %s488_s8, %s629_s8   ;;  %s454_s7 = sphi %s486_s7, %s628_s7   ;;  %s450_s6 = sphi %s484_s6, %s627_s6  }
   0x7   : > { %s29_s14 = sadd.s32 1, %s466_s10  ;;  %s38_s15 = sadd.s32 1, %s458_s8 }
   0x8   : > { %p31_p0 = scmp.ge.s32.totalorder %s29_s14, 2  ;;  %p45_p1 = scmp.ne.s32.totalorder %s458_s8, %s454_s7 }
   0x9   : > { %p46_p2 = scmp.eq.s32.totalorder %s470_s11, 0  ;;  %p51_p3 = scmp.ne.s32.totalorder %s454_s7, %s450_s6 }
   0xa   : > { %s633_s14 = smov (%p31_p0, %s29_s14), 0  ;;  %p52_p5 = scmp.eq.s32.totalorder %s282_s12, 0 }
   0xb   : > { %p525_p4 = por %p46_p2, %p45_p1  ;;  %s33_s17 = ssub.s32 %s466_s10, %s633_s14 }
   0xc   : > { %p77_p6 = scmp.eq.s32.totalorder %s282_s12, 1  ;;  %p36_p7 = scmp.eq.s32.totalorder %s33_s17, 0 }
   0xd   : > { %p531_p8 = por %p52_p5, %p51_p3  ;;  %p83_p10 = scmp.eq.s32.totalorder %s283_s13, 1 }
   0xe   : > { %p535_p9 = por %p77_p6, %p45_p1  ;;  %p311_p13 = scmp.lt.s32.totalorder %s470_s11, 2 }
   0xf   : > { %s540_s20 = scalar_select %p36_p7, %s458_s8, %s38_s15  }
  0x10   : > { %p542_p11 = por %p83_p10, %p51_p3  ;;  %s103_s22 = sand.u32 1, %s458_s8  }
  0x11   : > { %s286_s23 = sshll.u32 %s103_s22, 3  ;;  %s297_s24 = sshll.u32 %s466_s10, 7 }
  0x12   : > { %s623_s21 = scalar_select %p542_p11, 1, 0 }
  0x13   : > { %s115_s27 = scalar_lea.hbm %s618_s0, %s297_s24  ;;  %s107_s28 = scalar_lea.vmem [#allocation2], %s286_s23 }
  0x14   : > { %s117_s29 = sshll.u32 %s107_s28, 4  ;;  %p555_p0 = pnand %p311_p13, %p525_p4  ;;  %s118_s29 = int_to_ptr.vmem [resolvable:$true] %s117_s29 }
  0x15   : > { %p289_p1 = scmp.ge.s32.totalorder %s470_s11, 1  ;;  %p122_p2 = scmp.lt.s32.totalorder %s470_s11, 3 }
  0x16   : > { %s104_s2 = scalar_lea.sflag [#allocation3], %s103_s22  ;;  %p364_p3 = pneg %p555_p0 }
  0x17   : > { %s375_s3 = scalar_lea.vmem %s118_s29, 128  ;;  %s472_s4 = smov [#allocation2]  }
  0x18   : > { %p376_p5 = scmp.ne.s32.totalorder %s118_s29, %s375_s3  ;;  %s380_s5 = sshll.u32 %s472_s4, 4  ;;  %s381_s5 = int_to_ptr.vmem [resolvable:$false] %s380_s5 }
  0x19   : > { %s382_s12 = scalar_lea.vmem %s381_s5, 256  ;;  %p383_p10 = scmp.lt.s32.totalorder %s118_s29, %s381_s5 }
  0x1a   : > { %p378_p6 = pnand %p376_p5, %p364_p3  ;;  %p384_p12 = scmp.lt.s32.totalorder %s382_s12, %s375_s3 }
  0x1c   : > { %p379_p7 = pneg %p378_p6  ;;  %p385_p4 = por %p384_p12, %p383_p10 }
  0x1e   : > { %p386_p13 = pnand %p385_p4, %p379_p7 }
  0x20   : > { %389 = shalt.err (!%p386_p13)
}
  0x21   : > { %306 = dma.hbm_to_vmem [thread:$0]  (!%p555_p0), %s115_s27, 128, %s118_s29, %s104_s2  }
  0x22   : > { %p123_p11 = pnand %p289_p1, %p122_p2 }
  0x23   : > { %s570_s13 = sand.u32 (!%p123_p11), 1, %s454_s7  }
  0x24   : > { %126 = sbr.rel (%p123_p11) target bundleno = 79 (0x4f), region = 24  ;;  %s290_s15 = sshll.u32 (!%p123_p11), %s570_s13, 3 }
  0x25   : > { %s129_s16 = scalar_lea.sflag (!%p123_p11), [#allocation3], %s570_s13  ;;  %s132_s17 = scalar_lea.vmem (!%p123_p11), [#allocation2], %s290_s15 }
  0x29   : > { %441 = dma.done.wait (%p531_p8), %s129_s16, 128  }
  0x2a   : > { %443 = vsyncadd (%p531_p8), %s129_s16, 4294967168  ;;  %vm157_vm0 = vcmask 1043456   ;;  %v153_v0 = vld [vmem:[%s132_s17] sm:$0xff]  ;;  %s150_s18 = scalar_lea.vmem [#allocation5], %s290_s15  ;;  %s298_s23 = sshll.u32 %s462_s9, 7 }
  0x2b   : > { %v155_v1 = vcombine.high %v153_v0, %v153_v0  ;;  %v158_v2 = vsel %vm157_vm0, %v153_v0, 0.0  ;;  %s198_s22 = sshll.u32 %s150_s18, 4  ;;  %s196_s26 = scalar_lea.hbm %s619_s1, %s298_s23  ;;  %s199_s22 = int_to_ptr.vmem [resolvable:$true] %s198_s22 }
  0x2c   : > { %v159_v3 = vrot.slane %v158_v2, 4  ;;  %s182_s27 = scalar_lea.sflag [#allocation4], %s570_s13  ;;  %s390_s28 = scalar_lea.vmem %s199_s22, 128 }
  0x2d   : > { %v165_v4 = vsel %vm157_vm0, %v155_v1, 0.0  ;;  %p391_p8 = scmp.ne.s32.totalorder %s199_s22, %s390_s28  ;;  %s473_s29 = smov [#allocation5]  }
  0x2e   : > { %v160_v5 = vadd.f32 %v159_v3, %v158_v2  ;;  %v166_v6 = vrot.slane %v165_v4, 4  ;;  %s394_s30 = sshll.u32 %s473_s29, 4  ;;  %s395_s30 = int_to_ptr.vmem [resolvable:$false] %s394_s30 }
  0x2f   : > { %p392_p11 = pnand %p391_p8, %p535_p9  ;;  %s396_s2 = scalar_lea.vmem %s395_s30, 256 }
  0x30   : > { %v161_v7 = vrot.slane %v160_v5, 2  ;;  %v167_v8 = vadd.f32 %v166_v6, %v165_v4  ;;  %p397_p0 = scmp.lt.s32.totalorder %s199_s22, %s395_s30  ;;  %p398_p1 = scmp.lt.s32.totalorder %s396_s2, %s390_s28 }
  0x31   : > { %p393_p12 = pneg %p392_p11 }
  0x32   : > { %v162_v9 = vadd.f32 %v161_v7, %v160_v5  ;;  %v168_v10 = vrot.slane %v167_v8, 2  ;;  %p399_p2 = por %p398_p1, %p397_p0 }
  0x34   : > { %v163_v11 = vrot.slane %v162_v9, 1  ;;  %v169_v12 = vadd.f32 %v168_v10, %v167_v8  ;;  %p400_p3 = pnand %p399_p2, %p393_p12 }
  0x36   : > { %v164_v13 = vadd.f32 %v163_v11, %v162_v9  ;;  %v170_v14 = vrot.slane %v169_v12, 1 }
  0x38   : > { %v171_v15 = vadd.f32 %v170_v14, %v169_v12  ;;  %v172_v16 = vmul.f32 0.25, %v164_v13 }
  0x3a   : > { %v173_v17 = vmul.f32 0.25, %v171_v15 }
  0x3c   : > { %v176_v18 = vcombine.low %v172_v16, %v173_v17 }
  0x3e   : > { %v178_v19 = vsub.f32 %v153_v0, %v176_v18 }
  0x40   : > { %v179_v20 = vmax.f32 %v178_v19, 0.0 }
  0x42   : > { %180 = vst [vmem:[%s150_s18] sm:$0xff] %v179_v20 }
  0x43   : > { %403 = shalt.err (!%p400_p3)
}
  0x44   : > { %s404_s9 = scalar_lea.hbm %s196_s26, 128  ;;  %s408_s5 = scalar_lea.hbm %s619_s1, 256 }
  0x45   : > { %p405_p5 = scmp.ne.s32.totalorder %s196_s26, %s404_s9  ;;  %p409_p10 = scmp.lt.s32.totalorder %s196_s26, %s619_s1 }
  0x46   : > { %p410_p4 = scmp.lt.s32.totalorder %s408_s5, %s404_s9 }
  0x47   : > { %p406_p6 = pnand %p405_p5, %p535_p9 }
  0x48   : > { %p411_p13 = por %p410_p4, %p409_p10 }
  0x49   : > { %p407_p7 = pneg %p406_p6 }
  0x4b   : > { %p412_p8 = pnand %p411_p13, %p407_p7 }
  0x4d   : > { %415 = shalt.err (!%p412_p8)
}
  0x4e   : > { %301 = dma.vmem_to_hbm [thread:$0]  (%p535_p9), %s199_s22, 128, %s196_s26, %s182_s27  }
  0x4f PF: > { %s210_s15 = sand.u32 1, %s450_s6   ;;  %p625_p11 = scmp.ne.s32.totalorder %s623_s21, 0 }
  0x50   : > { %p626_p12 = scmp.ge.s32.totalorder %s470_s11, 2  ;;  %s211_s16 = scalar_lea.sflag [#allocation4], %s210_s15 }
  0x52   : > { %p308_p0 = pnand %p626_p12, %p625_p11 }
  0x54   : > { %p309_p1 = pneg %p308_p0 }
  0x56   : > { %445 = dma.done.wait (%p309_p1), %s211_s16, 128  }
  0x57   : > { %447 = vsyncadd (%p309_p1), %s211_s16, 4294967168  ;;  %s17_s11 = sadd.s32 1, %s470_s11   ;;  %s627_s6 = smov %s454_s7 }
  0x58   : > { %p14_p2 = scmp.ge.s32.totalorder %s17_s11, 4   ;;  %s628_s7 = smov %s458_s8 }
  0x59   : > { %s629_s8 = smov %s540_s20  ;;  %s630_s9 = smov %s466_s10 }
  0x5a   : > { %s631_s10 = smov %s633_s14  ;;  %16 = sbr.rel (!%p14_p2) target bundleno = 6 (0x6), region = 69 }
  0x5f   :  { %216 = vsyncpa [#allocation3], 1 }
  0x60   :  { %218 = vsyncpa [#allocation3 + $0x1], 1 }
  0x61   :  { %219 = vsyncpa [#allocation4], 1 }
  0x62   :  { %221 = vsyncpa [#allocation4 + $0x1], 1 }

</bundles_post_ra>
